<compile_context>
chip_gen: v7x
topology: tpu7x:2x2x1
jax: 0.10.0
libtpu: 0.0.40
codegen_flags: <defaults>
</compile_context>

<pallas_src>
import functools

import jax
import jax.numpy as jnp
from jax.experimental import pallas as pl
from jax.experimental.pallas import tpu as pltpu

LANES = 128          # TPU lane width
HIDDEN_PAD = 128     # hidden width (64) zero-padded to one full lane group
MAX_TILE_B = 1024    # batch rows per grid step for large batches:
                     #  * multiple of 256 -> fills the v6e/v7x 256-wide MXU M dim
                     #  * tile_b // 128 == 8 -> (8, 128) native-vreg output blocks
                     #  * VMEM use (2x 128KB x-buffers + ~50KB weights + spill
                     #    temps) stays far under v5e's 16MB / v6e-v7x's 32MB
                     #    scoped defaults, and under v7x's 64MB physical VMEM.


def mlp_kernel(x_ref, w1_ref, b1_ref, w2_ref, b2_ref, w3_ref, b3_ref, o_ref,
               *, tile_b):
    """Fused 3-layer MLP forward on one (tile_b, in_features) batch tile.

    MXU matmuls take bf16 operands and accumulate in f32; bias add / relu run
    on the f32 accumulator (no bf16 VPU ops -> v5e-safe).
    """
    # f32 -> bf16 cast happens in-kernel (saves a full host-side HBM pass).
    x = x_ref[...].astype(jnp.bfloat16)                          # (tile_b, in)

    h1 = jnp.dot(x, w1_ref[...], preferred_element_type=jnp.float32) + b1_ref[...]
    h1 = jnp.maximum(h1, 0.0).astype(jnp.bfloat16)               # relu (layer 0)

    h2 = jnp.dot(h1, w2_ref[...], preferred_element_type=jnp.float32) + b2_ref[...]
    h2 = jnp.maximum(h2, 0.0).astype(jnp.bfloat16)               # relu (layer 1)

    # Layer 2 has a single real output column, so compute it transposed:
    #   (1, HIDDEN_PAD) x (tile_b, HIDDEN_PAD)^T -> (1, tile_b)
    # Each batch row's scalar output lands in a lane -> lane-dense output.
    y_row = jax.lax.dot_general(
        w3_ref[...], h2, (((1,), (1,)), ((), ())),
        preferred_element_type=jnp.float32)                      # (1, tile_b)

    # Scatter the (1, tile_b) row into the compact (tile_b//128, 128) output
    # block with 128-aligned static slices (no relayout needed).
    for i in range(tile_b // LANES):                             # static, <= 8 iters
        o_ref[i:i + 1, :] = y_row[:, i * LANES:(i + 1) * LANES] + b3_ref[...]


@functools.partial(jax.jit, static_argnames=("out_features",))
def net_forward(x, kernel_params, out_features=1):
    """x: (batch, in_features) f32.  kernel_params: layout from pad_params().
    Returns (batch, out_features) f32.  (out_features must be 1.)"""
    assert out_features == 1, "kernel output compaction assumes a single output"
    w1, b1, w2, b2, w3, b3 = kernel_params
    batch, in_features = x.shape

    # Batch tile: <= MAX_TILE_B, multiple of 128.  Small batches use a single
    # grid step (output block == full output array); large batches use
    # 1024-row tiles so output blocks are exactly (8, 128).
    # TODO(synk): on v7x, split small batches into >=2 tiles so both
    # TensorCores get work (a single-step grid leaves one TC idle).
    if batch <= MAX_TILE_B:
        tile_b = max(LANES, pl.cdiv(batch, LANES) * LANES)
        num_steps = 1
    else:
        tile_b = MAX_TILE_B
        num_steps = pl.cdiv(batch, tile_b)   # ragged last tile: OOB rows are
                                             # garbage and sliced off below.

    out_rows = num_steps * (tile_b // LANES)

    def resident(a):  # weights/biases: constant index_map -> DMA'd once, stay in VMEM
        return pl.BlockSpec(a.shape, lambda i: (0, 0))

    hid = HIDDEN_PAD
    cost = pl.CostEstimate(
        flops=2 * batch * (in_features * hid + hid * hid + hid),
        transcendentals=0,
        bytes_accessed=(x.size * 4 + batch * 4
                        + sum(int(p.size) * p.dtype.itemsize for p in kernel_params)),
    )

    y_tiles = pl.pallas_call(
        functools.partial(mlp_kernel, tile_b=tile_b),
        out_shape=jax.ShapeDtypeStruct((out_rows, LANES), jnp.float32),
        grid=(num_steps,),
        in_specs=[
            pl.BlockSpec((tile_b, in_features), lambda i: (i, 0)),   # x tile (f32)
            resident(w1), resident(b1),
            resident(w2), resident(b2),
            resident(w3), resident(b3),
        ],
        out_specs=pl.BlockSpec((tile_b // LANES, LANES), lambda i: (i, 0)),
        compiler_params=pltpu.CompilerParams(
            dimension_semantics=("parallel",)),   # v7x: shard tiles over both TCs
        cost_estimate=cost,
    )(x, w1, b1, w2, b2, w3, b3)

    # Lane-dense compact slab -> (batch, 1); garbage padded rows are dropped.
    return y_tiles.reshape(-1)[:batch].reshape(batch, out_features)


def init_params(key, in_features, hidden, out_features):
    """Mirror Net.init_weights(): xavier-uniform weights, biases filled 0.01.
    Weights are stored pre-transposed as (in, out) so the kernel does x @ W."""
    def xavier(k, fan_in, fan_out):
        limit = jnp.sqrt(6.0 / (fan_in + fan_out))
        return jax.random.uniform(k, (fan_in, fan_out), jnp.float32, -limit, limit)

    k1, k2, k3 = jax.random.split(key, 3)
    w1 = xavier(k1, in_features, hidden)
    w2 = xavier(k2, hidden, hidden)
    w3 = xavier(k3, hidden, out_features)
    b1 = jnp.full((1, hidden), 0.01, jnp.float32)
    b2 = jnp.full((1, hidden), 0.01, jnp.float32)
    b3 = jnp.full((1, out_features), 0.01, jnp.float32)
    return (w1, b1, w2, b2, w3, b3)


def pad_params(params):
    """One-time conversion to the kernel layout:
      * hidden feature dims zero-padded to 128 lanes,
      * weights cast to bf16 (MXU operands), biases kept f32 (v5e-safe VPU path),
      * w3 stored as a (1, 128) ROW over the (padded) hidden dim,
      * b3 (a single scalar) replicated across 128 lanes (lanes = batch rows in
        the kernel's lane-dense output layout).
    Padded hidden channels have zero weights & bias, so relu(0)=0 keeps them inert."""
    w1, b1, w2, b2, w3, b3 = params
    in_features = w1.shape[0]
    assert w3.shape[1] == 1, "kernel layout assumes out_features == 1"

    def pad2(a, rows, cols):
        return jnp.pad(a, ((0, rows - a.shape[0]), (0, cols - a.shape[1])))

    w1p = pad2(w1, in_features, HIDDEN_PAD).astype(jnp.bfloat16)
    w2p = pad2(w2, HIDDEN_PAD, HIDDEN_PAD).astype(jnp.bfloat16)
    w3p = pad2(w3.T, 1, HIDDEN_PAD).astype(jnp.bfloat16)          # (1, 128) row
    b1p = pad2(b1, 1, HIDDEN_PAD)
    b2p = pad2(b2, 1, HIDDEN_PAD)
    b3p = jnp.full((1, LANES), b3[0, 0], jnp.float32)             # scalar, lane-bcast
    return (w1p, b1p, w2p, b2p, w3p, b3p)


def reference_forward(x, params):
    """Plain-JAX mirror of the kernel math (bf16 matmul operands, f32 accum)."""
    w1, b1, w2, b2, w3, b3 = params

    def lin(a, w, b):
        return jnp.dot(a.astype(jnp.bfloat16), w.astype(jnp.bfloat16),
                       preferred_element_type=jnp.float32) + b

    h1 = jnp.maximum(lin(x, w1, b1), 0.0)
    h2 = jnp.maximum(lin(h1, w2, b2), 0.0)
    return lin(h2, w3, b3)


if __name__ == "__main__":
    key = jax.random.PRNGKey(0)
    k_x, k_p = jax.random.split(key)

    batch, in_features, hidden, out_features = 256, 32, 64, 1
    x = jax.random.normal(k_x, (batch, in_features), jnp.float32)

    params = init_params(k_p, in_features, hidden, out_features)   # f32, unpadded
    kparams = pad_params(params)                                   # padded / bf16

    y = net_forward(x, kparams, out_features=out_features)
    y = jax.block_until_ready(y)

    y_ref = reference_forward(x, params)
    assert y.shape == (batch, out_features)
    assert jnp.allclose(y, y_ref, atol=1e-3, rtol=1e-3), \
        float(jnp.max(jnp.abs(y - y_ref)))

    print("KERNEL_OK")
</pallas_src>

<mosaic_0001>
module attributes {stable_mosaic.version = 11 : i64} {
  func.func @mlp_kernel(%arg0: i32, %arg1: memref<256x32xf32, #tpu.memory_space<vmem>>, %arg2: memref<32x128xbf16, #tpu.memory_space<vmem>>, %arg3: memref<1x128xf32, #tpu.memory_space<vmem>>, %arg4: memref<128x128xbf16, #tpu.memory_space<vmem>>, %arg5: memref<1x128xf32, #tpu.memory_space<vmem>>, %arg6: memref<1x128xbf16, #tpu.memory_space<vmem>>, %arg7: memref<1x128xf32, #tpu.memory_space<vmem>>, %arg8: memref<2x128xf32, #tpu.memory_space<vmem>>) attributes {dimension_semantics = [#tpu.dimension_semantics<parallel>], iteration_bounds = array<i64: 1>, scalar_prefetch = 0 : i64, scratch_operands = 0 : i64, tpu.core_type = #tpu.core_type<tc>, window_params = [{transform_indices = @transform_0, window_bounds = array<i64: 256, 32>}, {pipeline_mode = #tpu.pipeline_mode<synchronous>, transform_indices = @transform_1, window_bounds = array<i64: 32, 128>}, {pipeline_mode = #tpu.pipeline_mode<synchronous>, transform_indices = @transform_2, window_bounds = array<i64: 1, 128>}, {pipeline_mode = #tpu.pipeline_mode<synchronous>, transform_indices = @transform_3, window_bounds = array<i64: 128, 128>}, {pipeline_mode = #tpu.pipeline_mode<synchronous>, transform_indices = @transform_4, window_bounds = array<i64: 1, 128>}, {pipeline_mode = #tpu.pipeline_mode<synchronous>, transform_indices = @transform_5, window_bounds = array<i64: 1, 128>}, {pipeline_mode = #tpu.pipeline_mode<synchronous>, transform_indices = @transform_6, window_bounds = array<i64: 1, 128>}, {transform_indices = @transform_7, window_bounds = array<i64: 2, 128>}]} {
    %c0 = arith.constant 0 : index
    %c0_0 = arith.constant 0 : index
    %0 = vector.load %arg1[%c0, %c0_0] : memref<256x32xf32, #tpu.memory_space<vmem>>, vector<256x32xf32>
    %1 = arith.truncf %0 : vector<256x32xf32> to vector<256x32xbf16>
    %c0_1 = arith.constant 0 : index
    %c0_2 = arith.constant 0 : index
    %2 = vector.load %arg2[%c0_1, %c0_2] : memref<32x128xbf16, #tpu.memory_space<vmem>>, vector<32x128xbf16>
    %cst = arith.constant dense<0.000000e+00> : vector<256x128xf32>
    %3 = tpu.matmul %1, %2, %cst {dimension_numbers = #tpu.dot_dimension_numbers<[1], [0], [0], [1], [0, 0, 1, 1], [], []>} : vector<256x32xbf16>, vector<32x128xbf16>, vector<256x128xf32> -> vector<256x128xf32>
    %c0_3 = arith.constant 0 : index
    %c0_4 = arith.constant 0 : index
    %4 = vector.load %arg3[%c0_3, %c0_4] : memref<1x128xf32, #tpu.memory_space<vmem>>, vector<1x128xf32>
    %5 = vector.broadcast %4 : vector<1x128xf32> to vector<256x128xf32>
    %6 = arith.addf %3, %5 : vector<256x128xf32>
    %cst_5 = arith.constant 0.000000e+00 : f32
    %7 = vector.broadcast %cst_5 : f32 to vector<256x128xf32>
    %8 = arith.maximumf %6, %7 : vector<256x128xf32>
    %9 = arith.truncf %8 : vector<256x128xf32> to vector<256x128xbf16>
    %c0_6 = arith.constant 0 : index
    %c0_7 = arith.constant 0 : index
    %10 = vector.load %arg4[%c0_6, %c0_7] : memref<128x128xbf16, #tpu.memory_space<vmem>>, vector<128x128xbf16>
    %cst_8 = arith.constant dense<0.000000e+00> : vector<256x128xf32>
    %11 = tpu.matmul %9, %10, %cst_8 {dimension_numbers = #tpu.dot_dimension_numbers<[1], [0], [0], [1], [0, 0, 1, 1], [], []>} : vector<256x128xbf16>, vector<128x128xbf16>, vector<256x128xf32> -> vector<256x128xf32>
    %c0_9 = arith.constant 0 : index
    %c0_10 = arith.constant 0 : index
    %12 = vector.load %arg5[%c0_9, %c0_10] : memref<1x128xf32, #tpu.memory_space<vmem>>, vector<1x128xf32>
    %13 = vector.broadcast %12 : vector<1x128xf32> to vector<256x128xf32>
    %14 = arith.addf %11, %13 : vector<256x128xf32>
    %cst_11 = arith.constant 0.000000e+00 : f32
    %15 = vector.broadcast %cst_11 : f32 to vector<256x128xf32>
    %16 = arith.maximumf %14, %15 : vector<256x128xf32>
    %17 = arith.truncf %16 : vector<256x128xf32> to vector<256x128xbf16>
    %c0_12 = arith.constant 0 : index
    %c0_13 = arith.constant 0 : index
    %18 = vector.load %arg6[%c0_12, %c0_13] : memref<1x128xbf16, #tpu.memory_space<vmem>>, vector<1x128xbf16>
    %cst_14 = arith.constant dense<0.000000e+00> : vector<1x256xf32>
    %19 = tpu.matmul %18, %17, %cst_14 {dimension_numbers = #tpu.dot_dimension_numbers<[1], [1], [0], [0], [0, 0, 1, 0], [], []>} : vector<1x128xbf16>, vector<256x128xbf16>, vector<1x256xf32> -> vector<1x256xf32>
    %20 = vector.extract_strided_slice %19 {offsets = [0, 0], sizes = [1, 128], strides = [1, 1]} : vector<1x256xf32> to vector<1x128xf32>
    %c0_15 = arith.constant 0 : index
    %c0_16 = arith.constant 0 : index
    %21 = vector.load %arg7[%c0_15, %c0_16] : memref<1x128xf32, #tpu.memory_space<vmem>>, vector<1x128xf32>
    %22 = arith.addf %20, %21 : vector<1x128xf32>
    %c0_17 = arith.constant 0 : index
    %c0_18 = arith.constant 0 : index
    %23 = vector.load %arg8[%c0_17, %c0_18] : memref<2x128xf32, #tpu.memory_space<vmem>>, vector<1x128xf32>
    tpu.vector_store %arg8[%c0_17, %c0_18], %22 {strides = array<i32>} : memref<2x128xf32, #tpu.memory_space<vmem>>, vector<1x128xf32>,
    %24 = vector.extract_strided_slice %19 {offsets = [0, 128], sizes = [1, 128], strides = [1, 1]} : vector<1x256xf32> to vector<1x128xf32>
    %c0_19 = arith.constant 0 : index
    %c0_20 = arith.constant 0 : index
    %25 = vector.load %arg7[%c0_19, %c0_20] : memref<1x128xf32, #tpu.memory_space<vmem>>, vector<1x128xf32>
    %26 = arith.addf %24, %25 : vector<1x128xf32>
    %c1 = arith.constant 1 : index
    %c0_21 = arith.constant 0 : index
    %27 = vector.load %arg8[%c1, %c0_21] : memref<2x128xf32, #tpu.memory_space<vmem>>, vector<1x128xf32>
    tpu.vector_store %arg8[%c1, %c0_21], %26 {strides = array<i32>} : memref<2x128xf32, #tpu.memory_space<vmem>>, vector<1x128xf32>,
    return
  }
  func.func @transform_0(%arg0: i32) -> (i32, i32) {
    %c0_i32 = arith.constant 0 : i32
    %c0_i32_0 = arith.constant 0 : i32
    return %arg0, %c0_i32 : i32, i32
  }
  func.func @transform_1(%arg0: i32) -> (i32, i32) {
    %c0_i32 = arith.constant 0 : i32
    %c0_i32_0 = arith.constant 0 : i32
    %c0_i32_1 = arith.constant 0 : i32
    return %c0_i32, %c0_i32_0 : i32, i32
  }
  func.func @transform_2(%arg0: i32) -> (i32, i32) {
    %c0_i32 = arith.constant 0 : i32
    %c0_i32_0 = arith.constant 0 : i32
    %c0_i32_1 = arith.constant 0 : i32
    return %c0_i32, %c0_i32_0 : i32, i32
  }
  func.func @transform_3(%arg0: i32) -> (i32, i32) {
    %c0_i32 = arith.constant 0 : i32
    %c0_i32_0 = arith.constant 0 : i32
    %c0_i32_1 = arith.constant 0 : i32
    return %c0_i32, %c0_i32_0 : i32, i32
  }
  func.func @transform_4(%arg0: i32) -> (i32, i32) {
    %c0_i32 = arith.constant 0 : i32
    %c0_i32_0 = arith.constant 0 : i32
    %c0_i32_1 = arith.constant 0 : i32
    return %c0_i32, %c0_i32_0 : i32, i32
  }
  func.func @transform_5(%arg0: i32) -> (i32, i32) {
    %c0_i32 = arith.constant 0 : i32
    %c0_i32_0 = arith.constant 0 : i32
    %c0_i32_1 = arith.constant 0 : i32
    return %c0_i32, %c0_i32_0 : i32, i32
  }
  func.func @transform_6(%arg0: i32) -> (i32, i32) {
    %c0_i32 = arith.constant 0 : i32
    %c0_i32_0 = arith.constant 0 : i32
    %c0_i32_1 = arith.constant 0 : i32
    return %c0_i32, %c0_i32_0 : i32, i32
  }
  func.func @transform_7(%arg0: i32) -> (i32, i32) {
    %c0_i32 = arith.constant 0 : i32
    %c0_i32_0 = arith.constant 0 : i32
    return %arg0, %c0_i32 : i32, i32
  }
}

</mosaic_0001>

<bundles_post_ra>
// kernel: net_forward.1
= control target key start
LH: loop header
LB: loop body
LE: loop exit
PB: predicated region body
PF: predicated region fallthrough
CT: control target
= control target key end

     0   :  { %vm99_vm0 = vcmask 261120   ;;  %s1212_s0 = inlined_call_operand.vmem [shape: f32[256,32], index: 0, kind: input, shape index: {}]   ;;  %s1213_s1 = inlined_call_operand.vmem [shape: bf16[32,128], index: 1, kind: input, shape index: {}]   ;;  %s1214_s2 = inlined_call_operand.vmem [shape: f32[1,128], index: 2, kind: input, shape index: {}]   ;;  %s1215_s3 = inlined_call_operand.vmem [shape: bf16[128,128], index: 3, kind: input, shape index: {}]   ;;  %s1216_s4 = inlined_call_operand.vmem [shape: f32[1,128], index: 4, kind: input, shape index: {}]   ;;  %s1217_s5 = inlined_call_operand.vmem [shape: bf16[1,128], index: 5, kind: input, shape index: {}]   ;;  %s1218_s6 = inlined_call_operand.vmem [shape: f32[1,128], index: 6, kind: input, shape index: {}]   ;;  %s1219_s7 = inlined_call_operand.hbm [shape: f32[2,128], index: 7, kind: output, shape index: {}]  }
   0x1   :  { %v872_v0 = vld [vmem:[%s1213_s1] sm:$0xff]   ;;  %v873_v1 = vld [vmem:[%s1213_s1 + $0x8] sm:$0xff]   ;;  %v30_v5 = vld [vmem:[%s1212_s0 + $0x10] sm:$0xff] }
   0x2   :  { %787 = vmatprep.subr.bf16.mxu0 %v872_v0  ;;  %v28_v2 = vld [vmem:[%s1212_s0] sm:$0xff]  ;;  %v29_v3 = vld [vmem:[%s1212_s0 + $0x8] sm:$0xff]  ;;  %v31_v6 = vld [vmem:[%s1212_s0 + $0x18] sm:$0xff] }
   0x3   :  { %788 = vmatpush3.bf16.msra.mxu0 %v872_v0  ;;  %v60_v4 = vpack.c.bf16 %v29_v3, %v28_v2  ;;  %v32_v7 = vld [vmem:[%s1212_s0 + $0x20] sm:$0xff]  ;;  %v33_v8 = vld [vmem:[%s1212_s0 + $0x28] sm:$0xff]  ;;  %v61_v9 = vpack.c.bf16 %v31_v6, %v30_v5  ;;  %v34_v11 = vld [vmem:[%s1212_s0 + $0x30] sm:$0xff] }
   0x4   :  { %789 = vmatprep.subr.bf16.mxu0 %v873_v1  ;;  %v62_v10 = vpack.c.bf16 %v33_v8, %v32_v7  ;;  %v35_v12 = vld [vmem:[%s1212_s0 + $0x38] sm:$0xff]  ;;  %v36_v13 = vld [vmem:[%s1212_s0 + $0x40] sm:$0xff]  ;;  %v37_v14 = vld [vmem:[%s1212_s0 + $0x48] sm:$0xff] }
   0x5   :  { %791 = vmatprep.mubr.msk.bf16.mxu0 %vm99_vm0, %v60_v4  ;;  %v874_v15 = vld [vmem:[%s1215_s3] sm:$0xff]   ;;  %v63_v16 = vpack.c.bf16 %v35_v12, %v34_v11  ;;  %v875_v17 = vld [vmem:[%s1215_s3 + $0x8] sm:$0xff]   ;;  %v64_v18 = vpack.c.bf16 %v37_v14, %v36_v13  ;;  %v38_v19 = vld [vmem:[%s1212_s0 + $0x50] sm:$0xff] }
   0x6   :  { %823 = vmatprep.subr.bf16.mxu1 %v874_v15  ;;  %v876_v20 = vld [vmem:[%s1215_s3 + $0x10] sm:$0xff]   ;;  %v39_v21 = vld [vmem:[%s1212_s0 + $0x58] sm:$0xff]  ;;  %v40_v22 = vld [vmem:[%s1212_s0 + $0x60] sm:$0xff] }
   0x7   :  { %790 = vmatpush3.bf16.msra.mxu0 %v873_v1  ;;  %824 = vmatpush3.bf16.msra.mxu1 %v874_v15  ;;  %v41_v23 = vld [vmem:[%s1212_s0 + $0x68] sm:$0xff] }
   0x8   :  { %825 = vmatprep.subr.bf16.mxu1 %v875_v17 }
   0xa   :  { %792 = vmatmul.mubr.msk.bf16.vlgmr.msra.gmra.mrb[0].mxu0 %vm99_vm0, %v61_v9 }
   0xb   :  { %795 = vmatprep.mubr.msk.bf16.mxu0 %vm99_vm0, %v62_v10  ;;  %826 = vmatpush3.bf16.msra.mxu1 %v875_v17 }
  0x12   :  { %796 = vmatmul.mubr.msk.bf16.gmra.mrb[4].mxu0 %vm99_vm0, %v63_v16 }
  0x13   :  { %799 = vmatprep.mubr.msk.bf16.mxu0 %vm99_vm0, %v64_v18 }
  0x14   :  { %12 = vsyncpa [#allocation3], 0  ;;  %827 = vmatprep.subr.bf16.mxu1 %v876_v20  ;;  %v877_v24 = vld [vmem:[%s1215_s3 + $0x18] sm:$0xff]   ;;  %v65_v25 = vpack.c.bf16 %v39_v21, %v38_v19  ;;  %v66_v26 = vpack.c.bf16 %v41_v23, %v40_v22  ;;  %v878_v27 = vld [vmem:[%s1215_s3 + $0x20] sm:$0xff]   ;;  %s906_s17 = smov [#allocation2]  }
  0x15   :  { %828 = vmatpush3.bf16.msra.mxu1 %v876_v20  ;;  %v42_v28 = vld [vmem:[%s1212_s0 + $0x70] sm:$0xff]  ;;  %v43_v29 = vld [vmem:[%s1212_s0 + $0x78] sm:$0xff]  ;;  %v44_v30 = vld [vmem:[%s1212_s0 + $0x80] sm:$0xff]  ;;  %s691_s18 = sshll.u32 %s906_s17, 4  ;;  %s692_s18 = int_to_ptr.vmem [resolvable:$true] %s691_s18 }
  0x16   :  { %829 = vmatprep.subr.bf16.mxu1 %v877_v24  ;;  %v45_v31 = vld [vmem:[%s1212_s0 + $0x88] sm:$0xff]  ;;  %v67_v33 = vpack.c.bf16 %v43_v29, %v42_v28  ;;  %v46_v35 = vld [vmem:[%s1212_s0 + $0x90] sm:$0xff]  ;;  %v47_v36 = vld [vmem:[%s1212_s0 + $0x98] sm:$0xff]  ;;  %s882_s19 = scalar_lea.vmem %s692_s18, 32  ;;  %p887_p1 = scmp.lt.s32.totalorder %s692_s18, %s692_s18 }
  0x17   :  { %v879_v32 = vld [vmem:[%s1215_s3 + $0x28] sm:$0xff]   ;;  %v68_v34 = vpack.c.bf16 %v45_v31, %v44_v30  ;;  %v48_v37 = vld [vmem:[%s1212_s0 + $0xa0] sm:$0xff]  ;;  %v69_v39 = vpack.c.bf16 %v47_v36, %v46_v35  ;;  %v50_v41 = vld [vmem:[%s1212_s0 + $0xb0] sm:$0xff]  ;;  %p883_p0 = scmp.ne.s32.totalorder %s692_s18, %s882_s19  ;;  %p888_p2 = scmp.lt.s32.totalorder %s882_s19, %s882_s19 }
  0x18   :  { %v49_v38 = vld [vmem:[%s1212_s0 + $0xa8] sm:$0xff]  ;;  %v51_v42 = vld [vmem:[%s1212_s0 + $0xb8] sm:$0xff]  ;;  %v52_v43 = vld [vmem:[%s1212_s0 + $0xc0] sm:$0xff] }
  0x19   :  { %830 = vmatpush3.bf16.msra.mxu1 %v877_v24  ;;  %v70_v40 = vpack.c.bf16 %v49_v38, %v48_v37  ;;  %v53_v44 = vld [vmem:[%s1212_s0 + $0xc8] sm:$0xff]  ;;  %v71_v45 = vpack.c.bf16 %v51_v42, %v50_v41  ;;  %v54_v47 = vld [vmem:[%s1212_s0 + $0xd0] sm:$0xff]  ;;  %v55_v48 = vld [vmem:[%s1212_s0 + $0xd8] sm:$0xff]  ;;  %p889_p3 = por %p888_p2, %p887_p1 }
  0x1a   :  { %800 = vmatmul.mubr.msk.bf16.gmra.mrb[8].mxu0 %vm99_vm0, %v65_v25  ;;  %831 = vmatprep.subr.bf16.mxu1 %v878_v27  ;;  %v72_v46 = vpack.c.bf16 %v53_v44, %v52_v43  ;;  %v56_v49 = vld [vmem:[%s1212_s0 + $0xe0] sm:$0xff]  ;;  %v57_v50 = vld [vmem:[%s1212_s0 + $0xe8] sm:$0xff]  ;;  %v73_v51 = vpack.c.bf16 %v55_v48, %v54_v47  ;;  %v58_v53 = vld [vmem:[%s1212_s0 + $0xf0] sm:$0xff] }
  0x1b   :  { %803 = vmatprep.mubr.msk.bf16.mxu0 %vm99_vm0, %v66_v26  ;;  %v74_v52 = vpack.c.bf16 %v57_v50, %v56_v49  ;;  %v59_v54 = vld [vmem:[%s1212_s0 + $0xf8] sm:$0xff]  ;;  %v880_v56 = vld [vmem:[%s1215_s3 + $0x30] sm:$0xff]   ;;  %v1092_v58 = vld [vmem:[%s1214_s2] ss:$0 sm:$0xff]  ;;  %p890_p4 = pnand %p889_p3, %p883_p0 }
  0x1c   :  { %v75_v55 = vpack.c.bf16 %v59_v54, %v58_v53  ;;  %v881_v57 = vld [vmem:[%s1215_s3 + $0x38] sm:$0xff]  }
  0x1d   :  { %832 = vmatpush3.bf16.msra.mxu1 %v878_v27 }
  0x1e   :  { %833 = vmatprep.subr.bf16.mxu1 %v879_v32 }
  0x21   :  { %834 = vmatpush3.bf16.msra.mxu1 %v879_v32 }
  0x22   :  { %804 = vmatmul.mubr.msk.bf16.gmra.mrb[12].mxu0 %vm99_vm0, %v67_v33  ;;  %835 = vmatprep.subr.bf16.mxu1 %v880_v56 }
  0x23   :  { %807 = vmatprep.mubr.msk.bf16.mxu0 %vm99_vm0, %v68_v34 }
  0x25   :  { %836 = vmatpush3.bf16.msra.mxu1 %v880_v56 }
  0x26   :  { %837 = vmatprep.subr.bf16.mxu1 %v881_v57 }
  0x29   :  { %838 = vmatpush3.bf16.msra.mxu1 %v881_v57 }
  0x2a   :  { %808 = vmatmul.mubr.msk.bf16.gmra.mrb[16].mxu0 %vm99_vm0, %v69_v39 }
  0x2b   :  { %811 = vmatprep.mubr.msk.bf16.mxu0 %vm99_vm0, %v70_v40 }
  0x32   :  { %812 = vmatmul.mubr.msk.bf16.gmra.mrb[20].mxu0 %vm99_vm0, %v71_v45 }
  0x33   :  { %815 = vmatprep.mubr.msk.bf16.mxu0 %vm99_vm0, %v72_v46 }
  0x3a   :  { %816 = vmatmul.mubr.msk.bf16.gmra.mrb[24].mxu0 %vm99_vm0, %v73_v51 }
  0x3b   :  { %819 = vmatprep.mubr.msk.bf16.mxu0 %vm99_vm0, %v74_v52 }
  0x42   :  { %820 = vmatmul.mubr.msk.bf16.gmra.mrb[28].mxu0 %vm99_vm0, %v75_v55 }
  0xdd   :  { %v793_v59 = vpop.f32.mrb[0].mxu0 }
  0xde   :  { %v191_v60 = vadd.f32 %v793_v59, %v1092_v58  ;;  %v182_v61 = vpop.f32.mrb[1].mxu0 }
  0xdf   :  { %v183_v62 = vadd.f32 %v1092_v58, %v182_v61  ;;  %v794_v63 = vpop.f32.mrb[2].mxu0 }
  0xe0   :  { %v194_v0 = vadd.f32 %v794_v63, %v1092_v58  ;;  %v185_v1 = vpop.f32.mrb[3].mxu0  ;;  %v311_v3 = vmax.f32 %v191_v60, 0.0 }
  0xe1   :  { %v186_v2 = vadd.f32 %v1092_v58, %v185_v1  ;;  %v309_v5 = vmax.f32 %v183_v62, 0.0 }
  0xe2   :  { %v312_v4 = vmax.f32 %v194_v0, 0.0 }
  0xe3   :  { %v310_v6 = vmax.f32 %v186_v2, 0.0 }
  0xe4   :  { %v342_v7 = vpack.c.bf16 %v312_v4, %v311_v3 }
  0xe5   :  { %v797_v8 = vpop.f32.mrb[4].mxu0  ;;  %v341_v9 = vpack.c.bf16 %v310_v6, %v309_v5 }
  0xe6   :  { %v207_v10 = vadd.f32 %v797_v8, %v1092_v58  ;;  %v198_v11 = vpop.f32.mrb[5].mxu0 }
  0xe7   :  { %v199_v12 = vadd.f32 %v1092_v58, %v198_v11  ;;  %v798_v13 = vpop.f32.mrb[6].mxu0  ;;  %839 = vmatprep.mubr.bf16.mxu1 %v341_v9 }
  0xe8   :  { %v210_v14 = vadd.f32 %v798_v13, %v1092_v58  ;;  %v201_v15 = vpop.f32.mrb[7].mxu0  ;;  %840 = vmatmul.mubr.bf16.vlgmr.msra.gmra.mrb[0].mxu1 %v342_v7  ;;  %v315_v17 = vmax.f32 %v207_v10, 0.0 }
  0xe9   :  { %v202_v16 = vadd.f32 %v1092_v58, %v201_v15  ;;  %v313_v19 = vmax.f32 %v199_v12, 0.0 }
  0xea   :  { %v316_v18 = vmax.f32 %v210_v14, 0.0 }
  0xeb   :  { %v314_v20 = vmax.f32 %v202_v16, 0.0 }
  0xec   :  { %v344_v21 = vpack.c.bf16 %v316_v18, %v315_v17 }
  0xed   :  { %v343_v22 = vpack.c.bf16 %v314_v20, %v313_v19  ;;  %v801_v23 = vpop.f32.mrb[8].mxu0 }
  0xee   :  { %v223_v24 = vadd.f32 %v801_v23, %v1092_v58  ;;  %v214_v25 = vpop.f32.mrb[9].mxu0 }
  0xef   :  { %v215_v26 = vadd.f32 %v1092_v58, %v214_v25  ;;  %v802_v27 = vpop.f32.mrb[10].mxu0  ;;  %843 = vmatprep.mubr.bf16.mxu1 %v343_v22 }
  0xf0   :  { %v226_v28 = vadd.f32 %v802_v27, %v1092_v58  ;;  %v217_v29 = vpop.f32.mrb[11].mxu0  ;;  %844 = vmatmul.mubr.bf16.gmra.mrb[4].mxu1 %v344_v21  ;;  %v319_v31 = vmax.f32 %v223_v24, 0.0 }
  0xf1   :  { %v218_v30 = vadd.f32 %v1092_v58, %v217_v29  ;;  %v317_v33 = vmax.f32 %v215_v26, 0.0 }
  0xf2   :  { %v320_v32 = vmax.f32 %v226_v28, 0.0 }
  0xf3   :  { %v318_v34 = vmax.f32 %v218_v30, 0.0 }
  0xf4   :  { %v346_v35 = vpack.c.bf16 %v320_v32, %v319_v31 }
  0xf5   :  { %v345_v36 = vpack.c.bf16 %v318_v34, %v317_v33  ;;  %v805_v37 = vpop.f32.mrb[12].mxu0 }
  0xf6   :  { %v239_v38 = vadd.f32 %v805_v37, %v1092_v58  ;;  %v230_v39 = vpop.f32.mrb[13].mxu0 }
  0xf7   :  { %v231_v40 = vadd.f32 %v1092_v58, %v230_v39  ;;  %v806_v41 = vpop.f32.mrb[14].mxu0  ;;  %847 = vmatprep.mubr.bf16.mxu1 %v345_v36 }
  0xf8   :  { %v242_v42 = vadd.f32 %v806_v41, %v1092_v58  ;;  %v233_v43 = vpop.f32.mrb[15].mxu0  ;;  %848 = vmatmul.mubr.bf16.gmra.mrb[8].mxu1 %v346_v35  ;;  %v323_v45 = vmax.f32 %v239_v38, 0.0 }
  0xf9   :  { %v234_v44 = vadd.f32 %v1092_v58, %v233_v43  ;;  %v321_v47 = vmax.f32 %v231_v40, 0.0 }
  0xfa   :  { %v324_v46 = vmax.f32 %v242_v42, 0.0 }
  0xfb   :  { %v322_v48 = vmax.f32 %v234_v44, 0.0  ;;  %v1129_v44 = vld [vmem:[%s1217_s5] sm:$0x1] }
  0xfc   :  { %v348_v49 = vpack.c.bf16 %v324_v46, %v323_v45  ;;  %785 = vmatprep.mubr.bf16.mxu0 %v1129_v44  ;;  %v1135_v45 = vld [vmem:[%s1216_s4] ss:$0 sm:$0xff] }
  0xfd   :  { %v347_v50 = vpack.c.bf16 %v322_v48, %v321_v47  ;;  %v809_v51 = vpop.f32.mrb[16].mxu0 }
  0xfe   :  { %v255_v52 = vadd.f32 %v809_v51, %v1092_v58  ;;  %v246_v53 = vpop.f32.mrb[17].mxu0 }
  0xff   :  { %v247_v54 = vadd.f32 %v1092_v58, %v246_v53  ;;  %v810_v55 = vpop.f32.mrb[18].mxu0  ;;  %851 = vmatprep.mubr.bf16.mxu1 %v347_v50 }
 0x100   :  { %v258_v56 = vadd.f32 %v810_v55, %v1092_v58  ;;  %v249_v57 = vpop.f32.mrb[19].mxu0  ;;  %852 = vmatmul.mubr.bf16.gmra.mrb[12].mxu1 %v348_v49  ;;  %v327_v60 = vmax.f32 %v255_v52, 0.0 }
 0x101   :  { %v250_v59 = vadd.f32 %v1092_v58, %v249_v57  ;;  %v325_v62 = vmax.f32 %v247_v54, 0.0 }
 0x102   :  { %v328_v61 = vmax.f32 %v258_v56, 0.0 }
 0x103   :  { %v326_v63 = vmax.f32 %v250_v59, 0.0 }
 0x104   :  { %v350_v0 = vpack.c.bf16 %v328_v61, %v327_v60 }
 0x105   :  { %v349_v1 = vpack.c.bf16 %v326_v63, %v325_v62  ;;  %v813_v2 = vpop.f32.mrb[20].mxu0 }
 0x106   :  { %v271_v3 = vadd.f32 %v813_v2, %v1092_v58  ;;  %v262_v4 = vpop.f32.mrb[21].mxu0 }
 0x107   :  { %v263_v5 = vadd.f32 %v1092_v58, %v262_v4  ;;  %855 = vmatprep.mubr.bf16.mxu1 %v349_v1  ;;  %v814_v6 = vpop.f32.mrb[22].mxu0 }
 0x108   :  { %v331_v7 = vmax.f32 %v271_v3, 0.0  ;;  %v274_v8 = vadd.f32 %v814_v6, %v1092_v58  ;;  %856 = vmatmul.mubr.bf16.gmra.mrb[16].mxu1 %v350_v0  ;;  %v265_v9 = vpop.f32.mrb[23].mxu0 }
 0x109   :  { %v329_v10 = vmax.f32 %v263_v5, 0.0  ;;  %v266_v11 = vadd.f32 %v1092_v58, %v265_v9 }
 0x10a   :  { %v332_v12 = vmax.f32 %v274_v8, 0.0 }
 0x10b   :  { %v330_v13 = vmax.f32 %v266_v11, 0.0 }
 0x10c   :  { %v352_v14 = vpack.c.bf16 %v332_v12, %v331_v7 }
 0x10d   :  { %v351_v15 = vpack.c.bf16 %v330_v13, %v329_v10  ;;  %v817_v16 = vpop.f32.mrb[24].mxu0 }
 0x10e   :  { %v287_v17 = vadd.f32 %v817_v16, %v1092_v58  ;;  %v278_v18 = vpop.f32.mrb[25].mxu0 }
 0x10f   :  { %859 = vmatprep.mubr.bf16.mxu1 %v351_v15  ;;  %v279_v19 = vadd.f32 %v1092_v58, %v278_v18  ;;  %v818_v20 = vpop.f32.mrb[26].mxu0 }
 0x110   :  { %860 = vmatmul.mubr.bf16.gmra.mrb[20].mxu1 %v352_v14  ;;  %v335_v21 = vmax.f32 %v287_v17, 0.0  ;;  %v290_v22 = vadd.f32 %v818_v20, %v1092_v58  ;;  %v281_v23 = vpop.f32.mrb[27].mxu0 }
 0x111   :  { %v333_v24 = vmax.f32 %v279_v19, 0.0  ;;  %v282_v25 = vadd.f32 %v1092_v58, %v281_v23 }
 0x112   :  { %v336_v26 = vmax.f32 %v290_v22, 0.0 }
 0x113   :  { %v334_v27 = vmax.f32 %v282_v25, 0.0 }
 0x114   :  { %v354_v28 = vpack.c.bf16 %v336_v26, %v335_v21 }
 0x115   :  { %v353_v29 = vpack.c.bf16 %v334_v27, %v333_v24  ;;  %v821_v30 = vpop.f32.mrb[28].mxu0 }
 0x116   :  { %v303_v31 = vadd.f32 %v821_v30, %v1092_v58  ;;  %v294_v32 = vpop.f32.mrb[29].mxu0 }
 0x117   :  { %863 = vmatprep.mubr.bf16.mxu1 %v353_v29  ;;  %v295_v33 = vadd.f32 %v1092_v58, %v294_v32  ;;  %v822_v34 = vpop.f32.mrb[30].mxu0 }
 0x118   :  { %864 = vmatmul.mubr.bf16.gmra.mrb[24].mxu1 %v354_v28  ;;  %v339_v35 = vmax.f32 %v303_v31, 0.0  ;;  %v306_v36 = vadd.f32 %v822_v34, %v1092_v58  ;;  %v297_v37 = vpop.f32.mrb[31].mxu0 }
 0x119   :  { %v337_v38 = vmax.f32 %v295_v33, 0.0  ;;  %v298_v39 = vadd.f32 %v1092_v58, %v297_v37 }
 0x11a   :  { %v340_v40 = vmax.f32 %v306_v36, 0.0 }
 0x11b   :  { %v338_v41 = vmax.f32 %v298_v39, 0.0 }
 0x11c   :  { %v356_v42 = vpack.c.bf16 %v340_v40, %v339_v35 }
 0x11d   :  { %v355_v43 = vpack.c.bf16 %v338_v41, %v337_v38 }
 0x11f   :  { %867 = vmatprep.mubr.bf16.mxu1 %v355_v43 }
 0x120   :  { %868 = vmatmul.mubr.bf16.gmra.mrb[28].mxu1 %v356_v42 }
 0x1bb   :  { %v841_v46 = vpop.f32.mrb[0].mxu1 }
 0x1bc   :  { %v471_v58 = vadd.f32 %v841_v46, %v1135_v45  ;;  %v462_v47 = vpop.f32.mrb[1].mxu1 }
 0x1bd   :  { %v463_v48 = vadd.f32 %v1135_v45, %v462_v47  ;;  %v842_v49 = vpop.f32.mrb[2].mxu1 }
 0x1be   :  { %v474_v50 = vadd.f32 %v842_v49, %v1135_v45  ;;  %v465_v51 = vpop.f32.mrb[3].mxu1  ;;  %v591_v53 = vmax.f32 %v471_v58, 0.0 }
 0x1bf   :  { %v466_v52 = vadd.f32 %v1135_v45, %v465_v51  ;;  %v589_v55 = vmax.f32 %v463_v48, 0.0 }
 0x1c0   :  { %v592_v54 = vmax.f32 %v474_v50, 0.0 }
 0x1c1   :  { %v590_v56 = vmax.f32 %v466_v52, 0.0 }
 0x1c2   :  { %v1141_v57 = vpack.c.bf16 %v592_v54, %v591_v53 }
 0x1c3   :  { %v1143_v59 = vpack.c.bf16 %v590_v56, %v589_v55  ;;  %v845_v60 = vpop.f32.mrb[4].mxu1 }
 0x1c4   :  { %v487_v61 = vadd.f32 %v845_v60, %v1135_v45  ;;  %v478_v62 = vpop.f32.mrb[5].mxu1 }
 0x1c5   :  { %v479_v63 = vadd.f32 %v1135_v45, %v478_v62  ;;  %v846_v0 = vpop.f32.mrb[6].mxu1 }
 0x1c6   :  { %v490_v1 = vadd.f32 %v846_v0, %v1135_v45  ;;  %v481_v2 = vpop.f32.mrb[7].mxu1  ;;  %v595_v4 = vmax.f32 %v487_v61, 0.0 }
 0x1c7   :  { %v482_v3 = vadd.f32 %v1135_v45, %v481_v2  ;;  %v593_v6 = vmax.f32 %v479_v63, 0.0 }
 0x1c8   :  { %v596_v5 = vmax.f32 %v490_v1, 0.0 }
 0x1c9   :  { %v594_v7 = vmax.f32 %v482_v3, 0.0 }
 0x1ca   :  { %v1149_v8 = vpack.c.bf16 %v596_v5, %v595_v4 }
 0x1cb   :  { %v1151_v9 = vpack.c.bf16 %v594_v7, %v593_v6  ;;  %v849_v10 = vpop.f32.mrb[8].mxu1 }
 0x1cc   :  { %v503_v11 = vadd.f32 %v849_v10, %v1135_v45  ;;  %v494_v12 = vpop.f32.mrb[9].mxu1 }
 0x1cd   :  { %v495_v13 = vadd.f32 %v1135_v45, %v494_v12  ;;  %v850_v14 = vpop.f32.mrb[10].mxu1 }
 0x1ce   :  { %v506_v15 = vadd.f32 %v850_v14, %v1135_v45  ;;  %v497_v16 = vpop.f32.mrb[11].mxu1  ;;  %v599_v18 = vmax.f32 %v503_v11, 0.0 }
 0x1cf   :  { %v498_v17 = vadd.f32 %v1135_v45, %v497_v16  ;;  %v597_v20 = vmax.f32 %v495_v13, 0.0 }
 0x1d0   :  { %v600_v19 = vmax.f32 %v506_v15, 0.0 }
 0x1d1   :  { %v598_v21 = vmax.f32 %v498_v17, 0.0 }
 0x1d2   :  { %v1157_v22 = vpack.c.bf16 %v600_v19, %v599_v18 }
 0x1d3   :  { %v1159_v23 = vpack.c.bf16 %v598_v21, %v597_v20  ;;  %v853_v24 = vpop.f32.mrb[12].mxu1 }
 0x1d4   :  { %v519_v25 = vadd.f32 %v853_v24, %v1135_v45  ;;  %v510_v26 = vpop.f32.mrb[13].mxu1 }
 0x1d5   :  { %v511_v27 = vadd.f32 %v1135_v45, %v510_v26  ;;  %v854_v28 = vpop.f32.mrb[14].mxu1 }
 0x1d6   :  { %v522_v29 = vadd.f32 %v854_v28, %v1135_v45  ;;  %v513_v30 = vpop.f32.mrb[15].mxu1  ;;  %v603_v32 = vmax.f32 %v519_v25, 0.0 }
 0x1d7   :  { %v514_v31 = vadd.f32 %v1135_v45, %v513_v30  ;;  %v601_v34 = vmax.f32 %v511_v27, 0.0 }
 0x1d8   :  { %v604_v33 = vmax.f32 %v522_v29, 0.0 }
 0x1d9   :  { %v602_v35 = vmax.f32 %v514_v31, 0.0 }
 0x1da   :  { %v1165_v36 = vpack.c.bf16 %v604_v33, %v603_v32 }
 0x1db   :  { %v1167_v37 = vpack.c.bf16 %v602_v35, %v601_v34  ;;  %v857_v38 = vpop.f32.mrb[16].mxu1 }
 0x1dc   :  { %v535_v39 = vadd.f32 %v857_v38, %v1135_v45  ;;  %v526_v40 = vpop.f32.mrb[17].mxu1 }
 0x1dd   :  { %v527_v41 = vadd.f32 %v1135_v45, %v526_v40  ;;  %v858_v42 = vpop.f32.mrb[18].mxu1 }
 0x1de   :  { %v538_v43 = vadd.f32 %v858_v42, %v1135_v45  ;;  %v529_v46 = vpop.f32.mrb[19].mxu1  ;;  %v607_v47 = vmax.f32 %v535_v39, 0.0 }
 0x1df   :  { %v530_v58 = vadd.f32 %v1135_v45, %v529_v46  ;;  %v605_v49 = vmax.f32 %v527_v41, 0.0 }
 0x1e0   :  { %v608_v48 = vmax.f32 %v538_v43, 0.0 }
 0x1e1   :  { %v606_v50 = vmax.f32 %v530_v58, 0.0 }
 0x1e2   :  { %v630_v51 = vpack.c.bf16 %v608_v48, %v607_v47 }
 0x1e3   :  { %v629_v52 = vpack.c.bf16 %v606_v50, %v605_v49  ;;  %v861_v53 = vpop.f32.mrb[20].mxu1 }
 0x1e4   :  { %v551_v54 = vadd.f32 %v861_v53, %v1135_v45  ;;  %v542_v55 = vpop.f32.mrb[21].mxu1 }
 0x1e5   :  { %v543_v56 = vadd.f32 %v1135_v45, %v542_v55  ;;  %769 = vmatprep.subr.bf16.mxu0 %v629_v52  ;;  %v862_v60 = vpop.f32.mrb[22].mxu1 }
 0x1e6   :  { %v611_v61 = vmax.f32 %v551_v54, 0.0  ;;  %v554_v62 = vadd.f32 %v862_v60, %v1135_v45  ;;  %770 = vmatpush3.bf16.xpose.msra.mxu0 %v1143_v59  ;;  %v545_v63 = vpop.f32.mrb[23].mxu1 }
 0x1e7   :  { %v609_v0 = vmax.f32 %v543_v56, 0.0  ;;  %v546_v1 = vadd.f32 %v1135_v45, %v545_v63  ;;  %771 = vmatprep.subr.bf16.mxu0 %v630_v51 }
 0x1e8   :  { %v612_v2 = vmax.f32 %v554_v62, 0.0 }
 0x1e9   :  { %v610_v3 = vmax.f32 %v546_v1, 0.0 }
 0x1ea   :  { %v632_v4 = vpack.c.bf16 %v612_v2, %v611_v61 }
 0x1eb   :  { %v631_v5 = vpack.c.bf16 %v610_v3, %v609_v0  ;;  %v865_v6 = vpop.f32.mrb[24].mxu1 }
 0x1ec   :  { %v567_v7 = vadd.f32 %v865_v6, %v1135_v45  ;;  %v558_v10 = vpop.f32.mrb[25].mxu1 }
 0x1ed   :  { %v559_v11 = vadd.f32 %v1135_v45, %v558_v10  ;;  %v866_v12 = vpop.f32.mrb[26].mxu1 }
 0x1ee   :  { %772 = vmatpush3.bf16.xpose.msra.mxu0 %v1141_v57  ;;  %v615_v13 = vmax.f32 %v567_v7, 0.0  ;;  %v570_v59 = vadd.f32 %v866_v12, %v1135_v45  ;;  %v561_v14 = vpop.f32.mrb[27].mxu1 }
 0x1ef   :  { %773 = vmatprep.subr.bf16.mxu0 %v631_v5  ;;  %v613_v15 = vmax.f32 %v559_v11, 0.0  ;;  %v562_v16 = vadd.f32 %v1135_v45, %v561_v14 }
 0x1f0   :  { %v616_v17 = vmax.f32 %v570_v59, 0.0 }
 0x1f1   :  { %v614_v18 = vmax.f32 %v562_v16, 0.0 }
 0x1f2   :  { %v634_v19 = vpack.c.bf16 %v616_v17, %v615_v13 }
 0x1f3   :  { %v633_v20 = vpack.c.bf16 %v614_v18, %v613_v15  ;;  %v869_v21 = vpop.f32.mrb[28].mxu1 }
 0x1f4   :  { %v583_v24 = vadd.f32 %v869_v21, %v1135_v45  ;;  %v574_v25 = vpop.f32.mrb[29].mxu1 }
 0x1f5   :  { %v575_v26 = vadd.f32 %v1135_v45, %v574_v25  ;;  %v870_v27 = vpop.f32.mrb[30].mxu1 }
 0x1f6   :  { %774 = vmatpush3.bf16.xpose.msra.mxu0 %v1151_v9  ;;  %v619_v57 = vmax.f32 %v583_v24, 0.0  ;;  %v586_v28 = vadd.f32 %v870_v27, %v1135_v45  ;;  %v577_v29 = vpop.f32.mrb[31].mxu1 }
 0x1f7   :  { %775 = vmatprep.subr.bf16.mxu0 %v632_v4  ;;  %v617_v30 = vmax.f32 %v575_v26, 0.0  ;;  %v578_v31 = vadd.f32 %v1135_v45, %v577_v29  ;;  %v679_v45 = vld [vmem:[%s1218_s6] sm:$0x1] }
 0x1f8   :  { %v620_v32 = vmax.f32 %v586_v28, 0.0 }
 0x1f9   :  { %v618_v33 = vmax.f32 %v578_v31, 0.0 }
 0x1fa   :  { %v636_v34 = vpack.c.bf16 %v620_v32, %v619_v57 }
 0x1fb   :  { %v635_v35 = vpack.c.bf16 %v618_v33, %v617_v30 }
 0x1fe   :  { %776 = vmatpush3.bf16.xpose.msra.mxu0 %v1149_v8  ;;  %v682_v8 = vld [vmem:[%s1218_s6] sm:$0x1] }
 0x1ff   :  { %777 = vmatprep.subr.bf16.mxu0 %v633_v20 }
 0x206   :  { %778 = vmatpush3.bf16.xpose.msra.mxu0 %v1159_v23 }
 0x207   :  { %779 = vmatprep.subr.bf16.mxu0 %v634_v19 }
 0x20e   :  { %780 = vmatpush3.bf16.xpose.msra.mxu0 %v1157_v22 }
 0x20f   :  { %781 = vmatprep.subr.bf16.mxu0 %v635_v35 }
 0x216   :  { %782 = vmatpush3.bf16.xpose.msra.mxu0 %v1167_v37 }
 0x217   :  { %783 = vmatprep.subr.bf16.mxu0 %v636_v34 }
 0x21e   :  { %784 = vmatpush3.bf16.xpose.msra.mxu0 %v1165_v36 }
 0x225   :  { %786 = vmatmul.mubr.bf16.vlgmr.msra.gmra.mrb[32].mxu0 %v1129_v44 }
 0x2f8   :  { %v672_v9 = vpop.f32.mrb[32].mxu0 }
 0x2f9   :  { %v680_v22 = vadd.f32 %v679_v45, %v672_v9  ;;  %v674_v23 = vpop.f32.mrb[33].mxu0 }
 0x2fa   :  { %v683_v38 = vadd.f32 %v682_v8, %v674_v23  ;;  %v676_v37 = vpop.f32.mrb[34].mxu0 }
 0x2fb   :  { %681 = vst [vmem:[#allocation2] sm:$0x1] %v680_v22  ;;  %v677_v36 = vpop.f32.mrb[35].mxu0 }
 0x2fc   :  { %684 = vst [vmem:[#allocation2 + $0x1] sm:$0x1] %v683_v38 }
 0x2fd   :  { %893 = shalt.err (!%p890_p4)
}
 0x2fe   :  { %s894_s21 = scalar_lea.hbm %s1219_s7, 32 }
 0x2ff   :  { %p895_p5 = scmp.ne.s32.totalorder %s1219_s7, %s894_s21  ;;  %p898_p6 = scmp.lt.u32.totalorder %s894_s21, %s1219_s7 }
 0x301   :  { %p900_p7 = pnand %p898_p6, %p895_p5 }
 0x303   :  { %903 = shalt.err (!%p900_p7)
}
 0x304   :  { %694 = dma.vmem_to_hbm [thread:$0]  %s692_s18, 32, %s1219_s7, [#allocation3]  }
 0x305   :  { %904 = dma.done.wait [#allocation3], 32  }
 0x306   :  { %905 = vsyncadd [#allocation3], 4294967264 }
 0x307   :  { %698 = vsyncpa [#allocation3], 1 }

</bundles_post_ra>
